<compile_context>
chip_gen: v7x
topology: tpu7x:2x2x1
jax: 0.10.0
libtpu: 0.0.40
codegen_flags: <defaults>
</compile_context>

<pallas_src>
import functools

import jax
import jax.numpy as jnp
from jax.experimental import pallas as pl
from jax.experimental.pallas import tpu as pltpu

_LANE = 128
_SUBLANE = 8


def _round_up(x, m):
    return (x + m - 1) // m * m


# ----------------------------- Pallas kernels --------------------------------
def _gemm_bias_kernel(a_ref, w_ref, b_ref, o_ref):
    """Single-K-step bias-fused GEMM tile: o = a @ w + b (f32 accumulation).

    a_ref: (TM, CKK_pad) patches tile; w_ref: (CKK_pad, TN) pre-masked weight
    tile (VMEM-resident across the grid when its block index is constant);
    b_ref: (1, TN) f32 bias row; o_ref: (TM, TN) output tile.
    """
    acc = jnp.dot(a_ref[...], w_ref[...], preferred_element_type=jnp.float32)
    o_ref[...] = (acc + b_ref[...].astype(jnp.float32)).astype(o_ref.dtype)


def _gemm_bias_acc_kernel(a_ref, w_ref, b_ref, o_ref, acc_ref):
    """K-tiled bias-fused GEMM; f32 VMEM accumulator, bias folded into k==0."""
    k = pl.program_id(2)

    @pl.when(k == 0)
    def _():
        acc_ref[...] = jnp.broadcast_to(
            b_ref[...].astype(jnp.float32), acc_ref.shape)

    acc_ref[...] += jnp.dot(a_ref[...], w_ref[...],
                            preferred_element_type=jnp.float32)

    @pl.when(k == pl.num_programs(2) - 1)
    def _():
        o_ref[...] = acc_ref[...].astype(o_ref.dtype)


# ------------------------------ JAX glue --------------------------------------
def _im2col(x, K, stride, padding, dilation):
    """x: (N, C, H, W) -> patches (N*Ho*Wo, C*K*K) in final layout, plus Ho, Wo.

    Built from an NHWC view so the K*K-inflated data is emitted directly in its
    final row-major layout (no transpose of the inflated array).
    """
    N, C, H, W = x.shape
    x_nhwc = jnp.transpose(x, (0, 2, 3, 1))
    xp = jnp.pad(x_nhwc,
                 ((0, 0), (padding, padding), (padding, padding), (0, 0)))
    Hp, Wp = H + 2 * padding, W + 2 * padding
    eff_k = (K - 1) * dilation + 1
    Ho = (Hp - eff_k) // stride + 1
    Wo = (Wp - eff_k) // stride + 1

    cols = []
    for kh in range(K):
        for kw in range(K):
            h0 = kh * dilation
            w0 = kw * dilation
            cols.append(xp[:, h0:h0 + stride * Ho:stride,
                           w0:w0 + stride * Wo:stride, :])     # (N, Ho, Wo, C)
    # (N, Ho, Wo, C, K*K): C-major / (kh, kw)-minor matches OIHW weight flatten.
    cols = jnp.stack(cols, axis=-1)
    return cols.reshape(N * Ho * Wo, C * K * K), Ho, Wo


def _choose_tiles(M, CKK, C_out, op_bytes):
    """Pick (TM, TN, TK) and step counts with minimal padding waste."""
    sub = max(_SUBLANE, 32 // op_bytes)      # 8 for f32, 16 for bf16, 32 for i8

    # N (C_out) tiling: lane-dense; keep all of C_out in one tile when small.
    Cout_pad = _round_up(C_out, _LANE)
    if Cout_pad <= 512:
        TN = Cout_pad
    elif Cout_pad % 256 == 0:
        TN = 256
    else:
        TN = 128
    n_steps = Cout_pad // TN

    # M tiling: near-equal split around a ~512-row target.
    ms = max(1, pl.cdiv(M, 512))
    TM = _round_up(pl.cdiv(M, ms), sub)
    # v7x: make sure both TensorCores get at least one parallel tile.
    if ms * n_steps < 2 and pl.cdiv(M, sub) >= 2:
        ms = 2
        TM = _round_up(pl.cdiv(M, ms), sub)
    M_pad = TM * ms

    # K (reduction) tiling: single step (weight VMEM-resident when n_steps==1)
    # if blocks fit comfortably; else near-equal 128-aligned K tiles.
    CKK_pad0 = _round_up(CKK, sub)
    single_k = (CKK_pad0 <= 2048
                and TM * CKK_pad0 * op_bytes <= 8 * 1024 * 1024
                and CKK_pad0 * TN * op_bytes <= 4 * 1024 * 1024)
    if single_k:
        TK, ks = CKK_pad0, 1
    else:
        ks = max(1, pl.cdiv(CKK, 512))
        TK = _round_up(pl.cdiv(CKK, ks), _LANE)   # lane dim of the patches block
        ks = pl.cdiv(CKK, TK)
    CKK_pad = TK * ks

    return TM, TN, TK, ms, n_steps, ks, M_pad, Cout_pad, CKK_pad


def _vmem_cap_bytes():
    try:
        kind = jax.devices()[0].device_kind.lower()
    except Exception:
        kind = ""
    if "v5" in kind or "v6" in kind:
        return 100 * 1024 * 1024     # 128 MiB physical VMEM -> use the headroom
    return 48 * 1024 * 1024          # v7x (64 MiB per TC) / unknown: be safe


# ------------------------------ forward ---------------------------------------
@functools.partial(jax.jit,
                   static_argnames=("stride", "padding", "dilation",
                                    "fake_mask", "compute_dtype"))
def mask_conv2d_forward(x, weight, mask, bias, *, stride=1, padding=0,
                        dilation=1, fake_mask=False,
                        compute_dtype="bfloat16"):
    """Forward of MaskConv2d (groups=1): conv2d(x, weight * mask) + bias.

    x:      (N, C_in, H, W)        NCHW
    weight: (C_out, C_in, K, K)    OIHW
    mask:   (C_out, C_in)          (ones = no pruning)
    bias:   (C_out,) or None
    compute_dtype: GEMM operand dtype (default bfloat16; accumulation is f32).
    """
    # TODO(synk): groups > 1 grouped conv (the PyTorch module's
    # create_from_conv2d asserts groups == 1; only that case is implemented).
    N, C_in, H, W = x.shape
    C_out, _, K, _ = weight.shape
    CKK = C_in * K * K
    out_dtype = x.dtype
    op_dtype = jnp.dtype(compute_dtype)
    op_bytes = op_dtype.itemsize
    out_bytes = jnp.dtype(out_dtype).itemsize

    # Fold the mask into the weight ONCE, in f32, before any cast.
    w_eff = weight if fake_mask else weight * mask[:, :, None, None]
    w2d = w_eff.reshape(C_out, CKK).T                      # (CKK, C_out)

    # im2col (plain JAX glue).
    # TODO(synk): fuse the patch gather into the kernel ((kh,kw) grid axes on
    # NHWC activations) to avoid materializing the K*K-inflated patch matrix.
    patches, Ho, Wo = _im2col(x, K, stride, padding, dilation)
    M = N * Ho * Wo

    TM, TN, TK, ms, n_steps, ks, M_pad, Cout_pad, CKK_pad = _choose_tiles(
        M, CKK, C_out, op_bytes)

    patches = jnp.pad(patches, ((0, M_pad - M), (0, CKK_pad - CKK)))
    w2d = jnp.pad(w2d, ((0, CKK_pad - CKK), (0, Cout_pad - C_out)))
    b = bias if bias is not None else jnp.zeros((C_out,), jnp.float32)
    b_row = jnp.pad(b.astype(jnp.float32),
                    (0, Cout_pad - C_out)).reshape(1, Cout_pad)

    patches = patches.astype(op_dtype)
    w2d = w2d.astype(op_dtype)

    # Grid / specs: single-K fast path (no accumulator) vs K-tiled path.
    if ks == 1:
        grid = (ms, n_steps)
        in_specs = [
            pl.BlockSpec((TM, TK), lambda i, j: (i, 0)),    # patches
            pl.BlockSpec((TK, TN), lambda i, j: (0, j)),    # masked weight
            pl.BlockSpec((1, TN), lambda i, j: (0, j)),     # bias row
        ]
        out_specs = pl.BlockSpec((TM, TN), lambda i, j: (i, j))
        scratch_shapes = []
        dim_sem = ("parallel", "parallel")
        kernel = _gemm_bias_kernel
        a_reads = M_pad * CKK_pad                           # patches read once
        w_reads = (1 if n_steps == 1 else ms) * CKK_pad * Cout_pad
    else:
        grid = (ms, n_steps, ks)
        in_specs = [
            pl.BlockSpec((TM, TK), lambda i, j, k: (i, k)),
            pl.BlockSpec((TK, TN), lambda i, j, k: (k, j)),
            pl.BlockSpec((1, TN), lambda i, j, k: (0, j)),
        ]
        out_specs = pl.BlockSpec((TM, TN), lambda i, j, k: (i, j))
        scratch_shapes = [pltpu.VMEM((TM, TN), jnp.float32)]
        dim_sem = ("parallel", "parallel", "arbitrary")
        kernel = _gemm_bias_acc_kernel
        a_reads = n_steps * M_pad * CKK_pad                 # re-streamed per N
        w_reads = ms * CKK_pad * Cout_pad                   # re-streamed per M

    cost = pl.CostEstimate(
        flops=2 * M_pad * CKK_pad * Cout_pad,
        transcendentals=0,
        bytes_accessed=((a_reads + w_reads) * op_bytes
                        + M_pad * Cout_pad * out_bytes
                        + Cout_pad * 4))

    vmem_est = (2 * TM * TK * op_bytes           # patches (double-buffered)
                + 2 * TK * TN * op_bytes         # weight
                + 2 * TM * TN * out_bytes        # output
                + 2 * TN * 4)                    # bias row
    if ks > 1:
        vmem_est += TM * TN * 4                  # f32 accumulator scratch
    vmem_limit = int(min(_vmem_cap_bytes(),
                         max(32 * 1024 * 1024, 2 * vmem_est)))

    out = pl.pallas_call(
        kernel,
        out_shape=jax.ShapeDtypeStruct((M_pad, Cout_pad), out_dtype),
        grid_spec=pltpu.PrefetchScalarGridSpec(
            num_scalar_prefetch=0,
            grid=grid,
            in_specs=in_specs,
            out_specs=out_specs,
            scratch_shapes=scratch_shapes,
        ),
        compiler_params=pltpu.CompilerParams(
            dimension_semantics=dim_sem,
            vmem_limit_bytes=vmem_limit),
        cost_estimate=cost,
    )(patches, w2d, b_row)

    out = out[:M, :C_out]                        # drop M / C_out padding
    # (N*Ho*Wo, C_out) -> (N, Ho, Wo, C_out) -> NCHW
    return out.reshape(N, Ho, Wo, C_out).transpose(0, 3, 1, 2)


# --------------------------------- demo ----------------------------------------
if __name__ == "__main__":
    # MaskConv2d(in_channels=4, out_channels=8, kernel_size=3,
    #            stride=1, padding=1, dilation=1, groups=1, bias=True)
    N, C_in, H, W = 2, 4, 16, 16
    C_out, K = 8, 3
    stride, padding, dilation = 1, 1, 1

    key = jax.random.PRNGKey(0)
    kx, kwt, kb = jax.random.split(key, 3)
    x = jax.random.normal(kx, (N, C_in, H, W), dtype=jnp.float32)
    weight = jax.random.normal(kwt, (C_out, C_in, K, K), dtype=jnp.float32)
    bias = jax.random.normal(kb, (C_out,), dtype=jnp.float32)
    # Mask is initialized to ones in the module; zero one input channel here
    # to make the masking non-trivial (simulated pruning).
    mask = jnp.ones((C_out, C_in), dtype=jnp.float32).at[:, 1].set(0.0)

    # Pure-JAX reference (masked-weight conv), high precision.
    w_masked = weight * mask[:, :, None, None]
    y_ref = jax.lax.conv_general_dilated(
        x, w_masked,
        window_strides=(stride, stride),
        padding=((padding, padding), (padding, padding)),
        rhs_dilation=(dilation, dilation),
        dimension_numbers=("NCHW", "OIHW", "NCHW"),
        precision=jax.lax.Precision.HIGHEST,
    ) + bias[None, :, None, None]

    # float32 operand path (tight check).
    y_f32 = mask_conv2d_forward(x, weight, mask, bias,
                                stride=stride, padding=padding,
                                dilation=dilation, fake_mask=False,
                                compute_dtype="float32")
    y_f32 = jax.block_until_ready(y_f32)
    assert y_f32.shape == (N, C_out, H, W), y_f32.shape
    assert jnp.allclose(y_f32, y_ref, atol=5e-3, rtol=5e-3), float(
        jnp.max(jnp.abs(y_f32 - y_ref)))

    # Default bfloat16-operand path (f32 accumulation); relative-norm check
    # (scaled to the output magnitude rather than a loose absolute threshold).
    y_bf16 = mask_conv2d_forward(x, weight, mask, bias,
                                 stride=stride, padding=padding,
                                 dilation=dilation, fake_mask=False)
    y_bf16 = jax.block_until_ready(y_bf16)
    rel = float(jnp.linalg.norm(y_bf16 - y_ref) / jnp.linalg.norm(y_ref))
    assert rel < 2e-2, rel

    print("KERNEL_OK")
</pallas_src>

<mosaic_0001>
module attributes {stable_mosaic.version = 11 : i64} {
  func.func @_gemm_bias_kernel(%arg0: i32, %arg1: i32, %arg2: memref<256x40xf32, #tpu.memory_space<vmem>>, %arg3: memref<40x128xf32, #tpu.memory_space<vmem>>, %arg4: memref<1x128xf32, #tpu.memory_space<vmem>>, %arg5: memref<256x128xf32, #tpu.memory_space<vmem>>) attributes {dimension_semantics = [#tpu.dimension_semantics<parallel>, #tpu.dimension_semantics<parallel>], iteration_bounds = array<i64: 2, 1>, scalar_prefetch = 0 : i64, scratch_operands = 0 : i64, tpu.core_type = #tpu.core_type<tc>, window_params = [{transform_indices = @transform_0, window_bounds = array<i64: 256, 40>}, {transform_indices = @transform_1, window_bounds = array<i64: 40, 128>}, {transform_indices = @transform_2, window_bounds = array<i64: 1, 128>}, {transform_indices = @transform_3, window_bounds = array<i64: 256, 128>}]} {
    %c0 = arith.constant 0 : index
    %c0_0 = arith.constant 0 : index
    %0 = vector.load %arg2[%c0, %c0_0] : memref<256x40xf32, #tpu.memory_space<vmem>>, vector<256x40xf32>
    %c0_1 = arith.constant 0 : index
    %c0_2 = arith.constant 0 : index
    %1 = vector.load %arg3[%c0_1, %c0_2] : memref<40x128xf32, #tpu.memory_space<vmem>>, vector<40x128xf32>
    %cst = arith.constant dense<0.000000e+00> : vector<256x128xf32>
    %2 = tpu.matmul %0, %1, %cst {dimension_numbers = #tpu.dot_dimension_numbers<[1], [0], [0], [1], [0, 0, 1, 1], [], []>} : vector<256x40xf32>, vector<40x128xf32>, vector<256x128xf32> -> vector<256x128xf32>
    %c0_3 = arith.constant 0 : index
    %c0_4 = arith.constant 0 : index
    %3 = vector.load %arg4[%c0_3, %c0_4] : memref<1x128xf32, #tpu.memory_space<vmem>>, vector<1x128xf32>
    %4 = vector.broadcast %3 : vector<1x128xf32> to vector<256x128xf32>
    %5 = arith.addf %2, %4 : vector<256x128xf32>
    %c0_5 = arith.constant 0 : index
    %c0_6 = arith.constant 0 : index
    %6 = vector.load %arg5[%c0_5, %c0_6] : memref<256x128xf32, #tpu.memory_space<vmem>>, vector<256x128xf32>
    tpu.vector_store %arg5[%c0_5, %c0_6], %5 {strides = array<i32>} : memref<256x128xf32, #tpu.memory_space<vmem>>, vector<256x128xf32>,
    return
  }
  func.func @transform_0(%arg0: i32, %arg1: i32) -> (i32, i32) {
    %c0_i32 = arith.constant 0 : i32
    %c0_i32_0 = arith.constant 0 : i32
    return %arg0, %c0_i32 : i32, i32
  }
  func.func @transform_1(%arg0: i32, %arg1: i32) -> (i32, i32) {
    %c0_i32 = arith.constant 0 : i32
    %c0_i32_0 = arith.constant 0 : i32
    return %c0_i32, %arg1 : i32, i32
  }
  func.func @transform_2(%arg0: i32, %arg1: i32) -> (i32, i32) {
    %c0_i32 = arith.constant 0 : i32
    %c0_i32_0 = arith.constant 0 : i32
    return %c0_i32, %arg1 : i32, i32
  }
  func.func @transform_3(%arg0: i32, %arg1: i32) -> (i32, i32) {
    %c0_i32 = arith.constant 0 : i32
    return %arg0, %arg1 : i32, i32
  }
}

</mosaic_0001>

<bundles_post_ra>
// kernel: mask_conv2d_forward.1
= control target key start
LH: loop header
LB: loop body
LE: loop exit
PB: predicated region body
PF: predicated region fallthrough
CT: control target
= control target key end

     0   :  { %s948_s12 = smov 0   ;;  %s950_s13 = smov 0   ;;  %s1140_s0 = inlined_call_operand.vmem [shape: f32[512,40], index: 0, kind: input, shape index: {}]   ;;  %s1141_s1 = inlined_call_operand.vmem [shape: f32[40,128], index: 1, kind: input, shape index: {}]   ;;  %s1142_s2 = inlined_call_operand.vmem [shape: f32[1,128], index: 2, kind: input, shape index: {}]   ;;  %s1143_s3 = inlined_call_operand.vmem [shape: f32[512,128], index: 3, kind: output, shape index: {}]  }
   0x1   :  { %s952_s14 = smov 0  }
   0x2 LB: > { %s25_s15 = sadd.s32 1, %s922_s13  ;;  %p731_p0 = scmp.ge.s32.totalorder %s926_s14, 1  ;;  %s926_s14 = sphi %s952_s14, %s13_s14   ;;  %s922_s13 = sphi %s950_s13, %s1145_s13   ;;  %s918_s12 = sphi %s948_s12, %s1144_s12  }
   0x3   : > { %p27_p1 = scmp.ge.s32.totalorder %s25_s15, 2  ;;  %p169_p2 = scmp.lt.s32.totalorder %s926_s14, 3 }
   0x5   : > { %s1147_s15 = smov (%p27_p1, %s25_s15), 0  ;;  %p170_p3 = pnand %p731_p0, %p169_p2 }
   0x6   : > { %v257_v0 = vld [vmem:[%s1141_s1] sm:$0xff] (!%p170_p3)  ;;  %v258_v1 = vld [vmem:[%s1141_s1 + $0x8] sm:$0xff] (!%p170_p3)  ;;  %v259_v2 = vld [vmem:[%s1141_s1 + $0x10] sm:$0xff] (!%p170_p3)  ;;  %s732_s22 = sshll.u32 (!%p170_p3), %s918_s12, 5  ;;  %vm269_vm0 = vcmask (!%p170_p3), 326656  }
   0x7   : > { %173 = sbr.rel (%p170_p3) target bundleno = 264 (0x108), region = 32  ;;  %v866_v3 = vpack.c.bf16 (!%p170_p3), %v258_v1, %v257_v0  ;;  %v260_v4 = vld [vmem:[%s1141_s1 + $0x18] sm:$0xff] (!%p170_p3)  ;;  %p204_p4 = scmp.lt.s32.totalorder (!%p170_p3), %s732_s22, 63  ;;  %v261_v6 = vld [vmem:[%s1141_s1 + $0x20] sm:$0xff] (!%p170_p3) }
   0x8   : > { %v870_v5 = vpack.c.bf16 (!%p170_p3), %v260_v4, %v259_v2  ;;  %v1058_v39 = vld [vmem:[%s1142_s2] ss:$0 sm:$0xff] (!%p170_p3) }
   0x9   : > { %867 = vmatprep.subr.bf16.mxu0 (!%p170_p3), %v866_v3  ;;  %874 = vmatprep.subr.bf16.mxu1 (!%p170_p3), %v866_v3 }
   0xa   : > { %869 = vmatpush3.bf16.msra.mxu0 (!%p170_p3), %v866_v3  ;;  %877 = vmatpush3.bf16.msra.mxu1 (!%p170_p3), %v866_v3 }
   0xb   : > { %871 = vmatprep.subr.bf16.mxu0 (!%p170_p3), %v870_v5  ;;  %875 = vmatprep.subr.bf16.mxu1 (!%p170_p3), %v870_v5 }
   0xe   : > { %s1149_s22 = smov (!%p204_p4, %s732_s22), 63  ;;  %873 = vmatpush3.bf16.msra.mxu0 %v870_v5  ;;  %878 = vmatpush3.bf16.msra.mxu1 %v870_v5 }
   0xf   : > { %s733_s25 = sshll.u32 %s1149_s22, 3  ;;  %816 = vmatprep.subr.mxu0 %v261_v6  ;;  %876 = vmatprep.subr.mxu1 %v261_v6 }
  0x10   : > { %s989_s30 = scalar_lea.vmem %s1140_s0, %s733_s25  ;;  %s1065_s8 = scalar_lea.vmem %s1143_s3, %s733_s25 }
  0x11   : > { %v225_v7 = vld [vmem:[%s989_s30] sm:$0xff]  ;;  %v226_v9 = vld [vmem:[%s989_s30 + $0x8] sm:$0xff]  ;;  %v227_v11 = vld [vmem:[%s989_s30 + $0x10] sm:$0xff] }
  0x12   : > { %v241_v8 = vld [vmem:[%s989_s30 + $0x80] sm:$0xff]  ;;  %818 = vmatprep.mubr.msk.f32.mxu0 %vm269_vm0, %v225_v7  ;;  %v242_v10 = vld [vmem:[%s989_s30 + $0x88] sm:$0xff]  ;;  %v243_v12 = vld [vmem:[%s989_s30 + $0x90] sm:$0xff]  ;;  %817 = vmatpush3.msra.mxu0 %v261_v6 }
  0x13   : > { %842 = vmatprep.mubr.msk.f32.mxu1 %vm269_vm0, %v241_v8  ;;  %879 = vmatpush3.msra.mxu1 %v261_v6  ;;  %v228_v13 = vld [vmem:[%s989_s30 + $0x18] sm:$0xff]  ;;  %v229_v15 = vld [vmem:[%s989_s30 + $0x20] sm:$0xff]  ;;  %v230_v17 = vld [vmem:[%s989_s30 + $0x28] sm:$0xff] }
  0x14   : > { %819 = vmatmul.mubr.msk.f32.vlgmr.msra.gmra.mrb[0].mxu0 %vm269_vm0, %v226_v9  ;;  %843 = vmatmul.mubr.msk.f32.vlgmr.msra.gmra.mrb[0].mxu1 %vm269_vm0, %v242_v10  ;;  %v244_v14 = vld [vmem:[%s989_s30 + $0x98] sm:$0xff]  ;;  %v245_v16 = vld [vmem:[%s989_s30 + $0xa0] sm:$0xff]  ;;  %v246_v18 = vld [vmem:[%s989_s30 + $0xa8] sm:$0xff] }
  0x15   : > { %821 = vmatprep.mubr.msk.f32.mxu0 %vm269_vm0, %v227_v11  ;;  %845 = vmatprep.mubr.msk.f32.mxu1 %vm269_vm0, %v243_v12  ;;  %v231_v19 = vld [vmem:[%s989_s30 + $0x30] sm:$0xff]  ;;  %v232_v21 = vld [vmem:[%s989_s30 + $0x38] sm:$0xff]  ;;  %v233_v23 = vld [vmem:[%s989_s30 + $0x40] sm:$0xff] }
  0x16   : > { %v247_v20 = vld [vmem:[%s989_s30 + $0xb0] sm:$0xff]  ;;  %v248_v22 = vld [vmem:[%s989_s30 + $0xb8] sm:$0xff]  ;;  %v249_v24 = vld [vmem:[%s989_s30 + $0xc0] sm:$0xff] }
  0x17   : > { %v234_v25 = vld [vmem:[%s989_s30 + $0x48] sm:$0xff]  ;;  %v235_v27 = vld [vmem:[%s989_s30 + $0x50] sm:$0xff]  ;;  %v236_v29 = vld [vmem:[%s989_s30 + $0x58] sm:$0xff] }
  0x18   : > { %822 = vmatmul.mubr.msk.f32.gmra.mrb[2].mxu0 %vm269_vm0, %v228_v13  ;;  %846 = vmatmul.mubr.msk.f32.gmra.mrb[2].mxu1 %vm269_vm0, %v244_v14  ;;  %v250_v26 = vld [vmem:[%s989_s30 + $0xc8] sm:$0xff]  ;;  %v251_v28 = vld [vmem:[%s989_s30 + $0xd0] sm:$0xff]  ;;  %v252_v30 = vld [vmem:[%s989_s30 + $0xd8] sm:$0xff] }
  0x19   : > { %824 = vmatprep.mubr.msk.f32.mxu0 %vm269_vm0, %v229_v15  ;;  %848 = vmatprep.mubr.msk.f32.mxu1 %vm269_vm0, %v245_v16  ;;  %v237_v31 = vld [vmem:[%s989_s30 + $0x60] sm:$0xff]  ;;  %v238_v33 = vld [vmem:[%s989_s30 + $0x68] sm:$0xff]  ;;  %v239_v35 = vld [vmem:[%s989_s30 + $0x70] sm:$0xff] }
  0x1a   : > { %v253_v32 = vld [vmem:[%s989_s30 + $0xe0] sm:$0xff]  ;;  %v254_v34 = vld [vmem:[%s989_s30 + $0xe8] sm:$0xff]  ;;  %v255_v36 = vld [vmem:[%s989_s30 + $0xf0] sm:$0xff] }
  0x1b   : > { %v240_v37 = vld [vmem:[%s989_s30 + $0x78] sm:$0xff] }
  0x1c   : > { %825 = vmatmul.mubr.msk.f32.gmra.mrb[4].mxu0 %vm269_vm0, %v230_v17  ;;  %849 = vmatmul.mubr.msk.f32.gmra.mrb[4].mxu1 %vm269_vm0, %v246_v18  ;;  %v256_v38 = vld [vmem:[%s989_s30 + $0xf8] sm:$0xff] }
  0x1d   : > { %827 = vmatprep.mubr.msk.f32.mxu0 %vm269_vm0, %v231_v19  ;;  %851 = vmatprep.mubr.msk.f32.mxu1 %vm269_vm0, %v247_v20 }
  0x20   : > { %828 = vmatmul.mubr.msk.f32.gmra.mrb[6].mxu0 %vm269_vm0, %v232_v21  ;;  %852 = vmatmul.mubr.msk.f32.gmra.mrb[6].mxu1 %vm269_vm0, %v248_v22 }
  0x21   : > { %830 = vmatprep.mubr.msk.f32.mxu0 %vm269_vm0, %v233_v23  ;;  %854 = vmatprep.mubr.msk.f32.mxu1 %vm269_vm0, %v249_v24 }
  0x24   : > { %831 = vmatmul.mubr.msk.f32.gmra.mrb[8].mxu0 %vm269_vm0, %v234_v25  ;;  %855 = vmatmul.mubr.msk.f32.gmra.mrb[8].mxu1 %vm269_vm0, %v250_v26 }
  0x25   : > { %833 = vmatprep.mubr.msk.f32.mxu0 %vm269_vm0, %v235_v27  ;;  %857 = vmatprep.mubr.msk.f32.mxu1 %vm269_vm0, %v251_v28 }
  0x28   : > { %834 = vmatmul.mubr.msk.f32.gmra.mrb[10].mxu0 %vm269_vm0, %v236_v29  ;;  %858 = vmatmul.mubr.msk.f32.gmra.mrb[10].mxu1 %vm269_vm0, %v252_v30 }
  0x29   : > { %836 = vmatprep.mubr.msk.f32.mxu0 %vm269_vm0, %v237_v31  ;;  %860 = vmatprep.mubr.msk.f32.mxu1 %vm269_vm0, %v253_v32 }
  0x2c   : > { %837 = vmatmul.mubr.msk.f32.gmra.mrb[12].mxu0 %vm269_vm0, %v238_v33  ;;  %861 = vmatmul.mubr.msk.f32.gmra.mrb[12].mxu1 %vm269_vm0, %v254_v34 }
  0x2d   : > { %839 = vmatprep.mubr.msk.f32.mxu0 %vm269_vm0, %v239_v35  ;;  %863 = vmatprep.mubr.msk.f32.mxu1 %vm269_vm0, %v255_v36 }
  0x30   : > { %840 = vmatmul.mubr.msk.f32.gmra.mrb[14].mxu0 %vm269_vm0, %v240_v37  ;;  %864 = vmatmul.mubr.msk.f32.gmra.mrb[14].mxu1 %vm269_vm0, %v256_v38 }
  0xe7   : > { %v820_v40 = vpop.f32.mrb[0].mxu0  ;;  %v844_v41 = vpop.f32.mrb[0].mxu1 }
  0xe8   : > { %v438_v42 = vadd.f32 %v820_v40, %v1058_v39  ;;  %v518_v43 = vadd.f32 %v844_v41, %v1058_v39  ;;  %v432_v44 = vpop.f32.mrb[1].mxu0  ;;  %v512_v45 = vpop.f32.mrb[1].mxu1 }
  0xe9   : > { %v433_v46 = vadd.f32 %v1058_v39, %v432_v44  ;;  %v513_v47 = vadd.f32 %v1058_v39, %v512_v45 }
  0xea   : > { %592 = vst [vmem:[%s1065_s8 + $0x8] sm:$0xff] %v438_v42  ;;  %608 = vst [vmem:[%s1065_s8 + $0x88] sm:$0xff] %v518_v43 }
  0xeb   : > { %591 = vst [vmem:[%s1065_s8] sm:$0xff] %v433_v46  ;;  %607 = vst [vmem:[%s1065_s8 + $0x80] sm:$0xff] %v513_v47  ;;  %v823_v48 = vpop.f32.mrb[2].mxu0  ;;  %v847_v49 = vpop.f32.mrb[2].mxu1 }
  0xec   : > { %v448_v50 = vadd.f32 %v823_v48, %v1058_v39  ;;  %v528_v51 = vadd.f32 %v847_v49, %v1058_v39  ;;  %v442_v52 = vpop.f32.mrb[3].mxu0  ;;  %v522_v53 = vpop.f32.mrb[3].mxu1 }
  0xed   : > { %v443_v54 = vadd.f32 %v1058_v39, %v442_v52  ;;  %v523_v55 = vadd.f32 %v1058_v39, %v522_v53 }
  0xee   : > { %594 = vst [vmem:[%s1065_s8 + $0x18] sm:$0xff] %v448_v50  ;;  %610 = vst [vmem:[%s1065_s8 + $0x98] sm:$0xff] %v528_v51 }
  0xef   : > { %593 = vst [vmem:[%s1065_s8 + $0x10] sm:$0xff] %v443_v54  ;;  %609 = vst [vmem:[%s1065_s8 + $0x90] sm:$0xff] %v523_v55  ;;  %v826_v56 = vpop.f32.mrb[4].mxu0  ;;  %v850_v57 = vpop.f32.mrb[4].mxu1 }
  0xf0   : > { %v458_v58 = vadd.f32 %v826_v56, %v1058_v39  ;;  %v538_v59 = vadd.f32 %v850_v57, %v1058_v39  ;;  %v452_v60 = vpop.f32.mrb[5].mxu0  ;;  %v532_v61 = vpop.f32.mrb[5].mxu1 }
  0xf1   : > { %v453_v62 = vadd.f32 %v1058_v39, %v452_v60  ;;  %v533_v63 = vadd.f32 %v1058_v39, %v532_v61 }
  0xf2   : > { %596 = vst [vmem:[%s1065_s8 + $0x28] sm:$0xff] %v458_v58  ;;  %612 = vst [vmem:[%s1065_s8 + $0xa8] sm:$0xff] %v538_v59 }
  0xf3   : > { %595 = vst [vmem:[%s1065_s8 + $0x20] sm:$0xff] %v453_v62  ;;  %611 = vst [vmem:[%s1065_s8 + $0xa0] sm:$0xff] %v533_v63  ;;  %v829_v0 = vpop.f32.mrb[6].mxu0  ;;  %v853_v1 = vpop.f32.mrb[6].mxu1 }
  0xf4   : > { %v468_v2 = vadd.f32 %v829_v0, %v1058_v39  ;;  %v548_v3 = vadd.f32 %v853_v1, %v1058_v39  ;;  %v462_v4 = vpop.f32.mrb[7].mxu0  ;;  %v542_v5 = vpop.f32.mrb[7].mxu1 }
  0xf5   : > { %v463_v6 = vadd.f32 %v1058_v39, %v462_v4  ;;  %v543_v7 = vadd.f32 %v1058_v39, %v542_v5 }
  0xf6   : > { %598 = vst [vmem:[%s1065_s8 + $0x38] sm:$0xff] %v468_v2  ;;  %614 = vst [vmem:[%s1065_s8 + $0xb8] sm:$0xff] %v548_v3 }
  0xf7   : > { %597 = vst [vmem:[%s1065_s8 + $0x30] sm:$0xff] %v463_v6  ;;  %613 = vst [vmem:[%s1065_s8 + $0xb0] sm:$0xff] %v543_v7  ;;  %v832_v8 = vpop.f32.mrb[8].mxu0  ;;  %v856_v9 = vpop.f32.mrb[8].mxu1 }
  0xf8   : > { %v478_v10 = vadd.f32 %v832_v8, %v1058_v39  ;;  %v558_v11 = vadd.f32 %v856_v9, %v1058_v39  ;;  %v472_v12 = vpop.f32.mrb[9].mxu0  ;;  %v552_v13 = vpop.f32.mrb[9].mxu1 }
  0xf9   : > { %v473_v14 = vadd.f32 %v1058_v39, %v472_v12  ;;  %v553_v15 = vadd.f32 %v1058_v39, %v552_v13 }
  0xfa   : > { %600 = vst [vmem:[%s1065_s8 + $0x48] sm:$0xff] %v478_v10  ;;  %616 = vst [vmem:[%s1065_s8 + $0xc8] sm:$0xff] %v558_v11 }
  0xfb   : > { %599 = vst [vmem:[%s1065_s8 + $0x40] sm:$0xff] %v473_v14  ;;  %615 = vst [vmem:[%s1065_s8 + $0xc0] sm:$0xff] %v553_v15  ;;  %v835_v16 = vpop.f32.mrb[10].mxu0  ;;  %v859_v17 = vpop.f32.mrb[10].mxu1 }
  0xfc   : > { %v488_v18 = vadd.f32 %v835_v16, %v1058_v39  ;;  %v568_v19 = vadd.f32 %v859_v17, %v1058_v39  ;;  %v482_v20 = vpop.f32.mrb[11].mxu0  ;;  %v562_v21 = vpop.f32.mrb[11].mxu1 }
  0xfd   : > { %v483_v22 = vadd.f32 %v1058_v39, %v482_v20  ;;  %v563_v23 = vadd.f32 %v1058_v39, %v562_v21 }
  0xfe   : > { %602 = vst [vmem:[%s1065_s8 + $0x58] sm:$0xff] %v488_v18  ;;  %618 = vst [vmem:[%s1065_s8 + $0xd8] sm:$0xff] %v568_v19 }
  0xff   : > { %601 = vst [vmem:[%s1065_s8 + $0x50] sm:$0xff] %v483_v22  ;;  %617 = vst [vmem:[%s1065_s8 + $0xd0] sm:$0xff] %v563_v23  ;;  %v838_v24 = vpop.f32.mrb[12].mxu0  ;;  %v862_v25 = vpop.f32.mrb[12].mxu1 }
 0x100   : > { %v498_v26 = vadd.f32 %v838_v24, %v1058_v39  ;;  %v578_v27 = vadd.f32 %v862_v25, %v1058_v39  ;;  %v492_v28 = vpop.f32.mrb[13].mxu0  ;;  %v572_v29 = vpop.f32.mrb[13].mxu1 }
 0x101   : > { %v493_v30 = vadd.f32 %v1058_v39, %v492_v28  ;;  %v573_v31 = vadd.f32 %v1058_v39, %v572_v29 }
 0x102   : > { %604 = vst [vmem:[%s1065_s8 + $0x68] sm:$0xff] %v498_v26  ;;  %620 = vst [vmem:[%s1065_s8 + $0xe8] sm:$0xff] %v578_v27 }
 0x103   : > { %603 = vst [vmem:[%s1065_s8 + $0x60] sm:$0xff] %v493_v30  ;;  %619 = vst [vmem:[%s1065_s8 + $0xe0] sm:$0xff] %v573_v31  ;;  %v841_v32 = vpop.f32.mrb[14].mxu0  ;;  %v865_v33 = vpop.f32.mrb[14].mxu1 }
 0x104   : > { %v508_v34 = vadd.f32 %v841_v32, %v1058_v39  ;;  %v588_v35 = vadd.f32 %v865_v33, %v1058_v39  ;;  %v502_v36 = vpop.f32.mrb[15].mxu0  ;;  %v582_v37 = vpop.f32.mrb[15].mxu1 }
 0x105   : > { %v503_v38 = vadd.f32 %v1058_v39, %v502_v36  ;;  %v583_v40 = vadd.f32 %v1058_v39, %v582_v37 }
 0x106   : > { %606 = vst [vmem:[%s1065_s8 + $0x78] sm:$0xff] %v508_v34  ;;  %622 = vst [vmem:[%s1065_s8 + $0xf8] sm:$0xff] %v588_v35 }
 0x107   : > { %605 = vst [vmem:[%s1065_s8 + $0x70] sm:$0xff] %v503_v38  ;;  %621 = vst [vmem:[%s1065_s8 + $0xf0] sm:$0xff] %v583_v40 }
 0x108 PF: > { %s13_s14 = sadd.s32 1, %s926_s14   ;;  %s1144_s12 = smov %s922_s13 }
 0x109   : > { %p10_p5 = scmp.ge.s32.totalorder %s13_s14, 4   ;;  %s1145_s13 = smov %s1147_s15 }
 0x10b   :  { %12 = sbr.rel (!%p10_p5) target bundleno = 2 (0x2), region = 68 }

</bundles_post_ra>
